<compile_context>
chip_gen: v5e
topology: v5e:2x2
jax: 0.10.0
libtpu: 0.0.40
codegen_flags: <defaults>
</compile_context>

<pallas_src>
import jax
import jax.numpy as jnp
from jax.experimental import pallas as pl
from jax.experimental.pallas import tpu as pltpu

LANE = 128
SUBLANE = 16          # bf16 sublane packing


def moe_decoder_kernel(code_ref, gw_ref, gb_ref, w1_ref, b1_ref,
                       expand_ref, w2b2_ref, weighted_ref, gates_ref):
    code = code_ref[...]                                              # (BP, CPAD) bf16

    # ---- gate: bf16 MXU matmul (f32 acc) + f32 softmax over padded expert lanes ----
    logits = jnp.dot(code, gw_ref[...],
                     preferred_element_type=jnp.float32) + gb_ref[...]   # (BP, EPAD)
    m = jnp.max(logits, axis=-1, keepdims=True)
    ex = jnp.exp(logits - m)                       # pad lanes: exp(-inf) == 0
    denom = jnp.sum(ex, axis=-1, keepdims=True)
    gates = ex * pl.reciprocal(denom, approx=True)                    # (BP, EPAD) f32
    gates_ref[...] = gates

    # ---- experts, fused: one wide matmul, f32 ReLU, gate fold, one wide matmul ----
    h = jnp.dot(code, w1_ref[...],
                preferred_element_type=jnp.float32) + b1_ref[...]     # (BP, EHPAD) f32
    h = jnp.maximum(h, 0.0)                                           # ReLU (f32 VPU)

    # scale[:, e*H:(e+1)*H] == gates[:, e] via a 0/1 block-expansion MXU matmul
    # (no cross-lane broadcasts / width-1 slices).
    gates_b = gates.astype(jnp.bfloat16)
    scale = jnp.dot(gates_b, expand_ref[...],
                    preferred_element_type=jnp.float32)               # (BP, EHPAD) f32

    hs = (h * scale).astype(jnp.bfloat16)                             # (BP, EHPAD)
    # Fused W2 + gate-weighted b2:  x = [h*scale | gates],  W = [[W2_all],[b2_mat]]
    x = jnp.concatenate([hs, gates_b], axis=-1)                       # (BP, EHPAD+EPAD)
    weighted_ref[...] = jnp.dot(x, w2b2_ref[...],
                                preferred_element_type=jnp.float32)   # (BP, DPAD) f32


def _pad_up(n, m):
    return pl.cdiv(n, m) * m


def _pick_block_b():
    # 512 rows amortizes the ~0.35us per-grid-step overhead and fills the
    # 256-row MXU M dim on v6e (128 MiB VMEM); cap at 256 on smaller-VMEM
    # chips (v7x: 64 MiB) and on v5e (128x128 MXU).
    try:
        vmem = pltpu.get_tpu_info().vmem_capacity_bytes
        return 512 if vmem >= (100 << 20) else 256
    except Exception:
        return 256


def moe_decoder(code, gate_w, gate_b, w1, b1, w2, b2, *, block_b=None):
    """code: (B, C); gate_w: (C, E); gate_b: (1, E);
       w1: (E, C, H); b1: (E, 1, H); w2: (E, H, D); b2: (E, 1, D)."""
    f32, bf16 = jnp.float32, jnp.bfloat16
    B, C = code.shape
    E = gate_w.shape[1]
    H = w1.shape[2]
    D = w2.shape[2]
    EH = E * H

    CPAD = _pad_up(C, LANE)       # lane-dense K for the gate / W1 matmuls
    EPAD = _pad_up(E, LANE)
    EHPAD = _pad_up(EH, LANE)
    DPAD = _pad_up(D, LANE)

    # ---- wrapper-side layout packing (lane-dense, zero / -inf padded) ----
    gw_pad = jnp.zeros((CPAD, EPAD), bf16).at[:C, :E].set(gate_w.astype(bf16))
    gb_pad = jnp.full((1, EPAD), -jnp.inf, f32).at[:, :E].set(
        gate_b.reshape(1, E).astype(f32))

    w1_all = jnp.zeros((CPAD, EHPAD), bf16).at[:C, :EH].set(
        jnp.transpose(w1.astype(bf16), (1, 0, 2)).reshape(C, EH))
    b1_all = jnp.zeros((1, EHPAD), f32).at[:, :EH].set(
        b1.astype(f32).reshape(1, EH))

    # Fused W2 / b2: rows 0..EH hold W2_all, rows EHPAD..EHPAD+E hold b2
    # (picked up by the gates lanes concatenated onto h*scale in the kernel).
    w2b2 = jnp.zeros((EHPAD + EPAD, DPAD), bf16)
    w2b2 = w2b2.at[:EH, :D].set(w2.astype(bf16).reshape(EH, D))
    w2b2 = w2b2.at[EHPAD:EHPAD + E, :D].set(b2.astype(bf16).reshape(E, D))

    # block-expansion matrix: row e carries ones on lanes e*H..(e+1)*H
    # (0/1 values are exact in bf16 -> half the VMEM/DMA of f32).
    expand = jnp.zeros((EPAD, EHPAD), bf16).at[:E, :EH].set(
        jnp.repeat(jnp.eye(E, dtype=bf16), H, axis=1))

    # ---- batch tiling ----
    if block_b is None:
        block_b = _pick_block_b()
    B16 = _pad_up(B, SUBLANE)                     # bf16 sublane tile
    BP = min(block_b, B16)
    if pl.cdiv(B16, BP) < 2 and B16 >= 2 * SUBLANE:
        # >= 2 grid steps so v7x's second TensorCore gets work.
        BP = _pad_up(pl.cdiv(B16, 2), SUBLANE)
    nb = pl.cdiv(B16, BP)
    Bpad = nb * BP
    code_p = jnp.zeros((Bpad, CPAD), bf16).at[:B, :C].set(code.astype(bf16))

    def row_spec(shp):                              # tiled over the batch axis
        return pl.BlockSpec(shp, lambda i: (i, 0))

    def fix_spec(shp):
        # Constant index_map -> weights stay VMEM-resident; single-buffer them
        # so they don't cost 2x VMEM (matters most on v7x's 64 MiB).
        return pl.BlockSpec(shp, lambda i: (0, 0), pipeline_mode=pl.Buffered(1))

    flops = 2 * Bpad * (CPAD * EPAD + CPAD * EHPAD + EPAD * EHPAD
                        + (EHPAD + EPAD) * DPAD)
    bytes_accessed = (2 * (Bpad * CPAD + CPAD * EPAD + CPAD * EHPAD
                           + EPAD * EHPAD + (EHPAD + EPAD) * DPAD)
                      + 4 * (EPAD + EHPAD + Bpad * DPAD + Bpad * EPAD))

    # explicit VMEM budget: single-buffered bf16 weights + f32 biases,
    # double-buffered code/output tiles, f32/bf16 activation temporaries.
    weight_vmem = 2 * (CPAD * EPAD + CPAD * EHPAD + EPAD * EHPAD
                       + (EHPAD + EPAD) * DPAD) + 4 * (EPAD + EHPAD)
    io_vmem = 2 * (BP * CPAD * 2 + BP * (DPAD + EPAD) * 4)
    act_vmem = BP * (3 * EHPAD + 3 * EPAD) * 4 + BP * (2 * EHPAD + EPAD) * 2
    vmem_limit = int(weight_vmem + io_vmem + act_vmem) + (8 << 20)

    weighted_p, gates_p = pl.pallas_call(
        moe_decoder_kernel,
        out_shape=(jax.ShapeDtypeStruct((Bpad, DPAD), f32),
                   jax.ShapeDtypeStruct((Bpad, EPAD), f32)),
        grid=(nb,),
        in_specs=[row_spec((BP, CPAD)),
                  fix_spec((CPAD, EPAD)), fix_spec((1, EPAD)),
                  fix_spec((CPAD, EHPAD)), fix_spec((1, EHPAD)),
                  fix_spec((EPAD, EHPAD)),
                  fix_spec((EHPAD + EPAD, DPAD))],
        out_specs=(row_spec((BP, DPAD)), row_spec((BP, EPAD))),
        compiler_params=pltpu.CompilerParams(
            dimension_semantics=("parallel",),
            vmem_limit_bytes=vmem_limit),
        cost_estimate=pl.CostEstimate(flops=flops,
                                      transcendentals=Bpad * EPAD,
                                      bytes_accessed=bytes_accessed),
    )(code_p, gw_pad, gb_pad, w1_all, b1_all, expand, w2b2)

    return weighted_p[:B, :D], gates_p[:B, :E]


def reference(code, gate_w, gate_b, w1, b1, w2, b2):
    logits = code @ gate_w + gate_b
    gates = jax.nn.softmax(logits, axis=-1)
    h = jnp.maximum(jnp.einsum('bc,ech->ebh', code, w1) + b1, 0.0)   # (E, B, H)
    out = jnp.einsum('ebh,ehd->ebd', h, w2) + b2                     # (E, B, D)
    out = jnp.transpose(out, (1, 0, 2))                              # (B, E, D)
    weighted = jnp.einsum('bn,bnd->bd', gates, out)
    return weighted, gates


if __name__ == "__main__":
    # small shapes consistent with the module
    B, C, E, H, D = 8, 32, 4, 32, 16

    key = jax.random.PRNGKey(0)
    ks = jax.random.split(key, 8)
    code   = jax.random.normal(ks[0], (B, C), jnp.float32)
    gate_w = jax.random.normal(ks[1], (C, E), jnp.float32) * 0.1
    gate_b = jax.random.normal(ks[2], (1, E), jnp.float32) * 0.1
    w1     = jax.random.normal(ks[3], (E, C, H), jnp.float32) * 0.1
    b1     = jax.random.normal(ks[4], (E, 1, H), jnp.float32) * 0.1
    w2     = jax.random.normal(ks[5], (E, H, D), jnp.float32) * 0.1
    b2     = jax.random.normal(ks[6], (E, 1, D), jnp.float32) * 0.1

    weighted, gates = moe_decoder(code, gate_w, gate_b, w1, b1, w2, b2)
    jax.block_until_ready((weighted, gates))

    ref_w, ref_g = reference(code, gate_w, gate_b, w1, b1, w2, b2)
    # bf16 matmul inputs -> tolerances loosened vs. the f32 reference.
    assert jnp.allclose(weighted, ref_w, atol=2e-2, rtol=2e-2), \
        float(jnp.max(jnp.abs(weighted - ref_w)))
    assert jnp.allclose(gates, ref_g, atol=1e-2, rtol=1e-2), \
        float(jnp.max(jnp.abs(gates - ref_g)))

    print("KERNEL_OK")
</pallas_src>

<mosaic_0001>
module attributes {stable_mosaic.version = 11 : i64} {
  func.func @moe_decoder_kernel(%arg0: i32, %arg1: memref<16x128xbf16, #tpu.memory_space<vmem>>, %arg2: memref<128x128xbf16, #tpu.memory_space<vmem>>, %arg3: memref<1x128xf32, #tpu.memory_space<vmem>>, %arg4: memref<128x128xbf16, #tpu.memory_space<vmem>>, %arg5: memref<1x128xf32, #tpu.memory_space<vmem>>, %arg6: memref<128x128xbf16, #tpu.memory_space<vmem>>, %arg7: memref<256x128xbf16, #tpu.memory_space<vmem>>, %arg8: memref<16x128xf32, #tpu.memory_space<vmem>>, %arg9: memref<16x128xf32, #tpu.memory_space<vmem>>) attributes {dimension_semantics = [#tpu.dimension_semantics<parallel>], iteration_bounds = array<i64: 1>, scalar_prefetch = 0 : i64, scratch_operands = 0 : i64, tpu.core_type = #tpu.core_type<tc>, window_params = [{transform_indices = @transform_0, window_bounds = array<i64: 16, 128>}, {pipeline_mode = #tpu.pipeline_mode<synchronous>, transform_indices = @transform_1, window_bounds = array<i64: 128, 128>}, {pipeline_mode = #tpu.pipeline_mode<synchronous>, transform_indices = @transform_2, window_bounds = array<i64: 1, 128>}, {pipeline_mode = #tpu.pipeline_mode<synchronous>, transform_indices = @transform_3, window_bounds = array<i64: 128, 128>}, {pipeline_mode = #tpu.pipeline_mode<synchronous>, transform_indices = @transform_4, window_bounds = array<i64: 1, 128>}, {pipeline_mode = #tpu.pipeline_mode<synchronous>, transform_indices = @transform_5, window_bounds = array<i64: 128, 128>}, {pipeline_mode = #tpu.pipeline_mode<synchronous>, transform_indices = @transform_6, window_bounds = array<i64: 256, 128>}, {transform_indices = @transform_7, window_bounds = array<i64: 16, 128>}, {transform_indices = @transform_8, window_bounds = array<i64: 16, 128>}]} {
    %c0 = arith.constant 0 : index
    %c0_0 = arith.constant 0 : index
    %0 = vector.load %arg1[%c0, %c0_0] : memref<16x128xbf16, #tpu.memory_space<vmem>>, vector<16x128xbf16>
    %c0_1 = arith.constant 0 : index
    %c0_2 = arith.constant 0 : index
    %1 = vector.load %arg2[%c0_1, %c0_2] : memref<128x128xbf16, #tpu.memory_space<vmem>>, vector<128x128xbf16>
    %cst = arith.constant dense<0.000000e+00> : vector<16x128xf32>
    %2 = tpu.matmul %0, %1, %cst {dimension_numbers = #tpu.dot_dimension_numbers<[1], [0], [0], [1], [0, 0, 1, 1], [], []>} : vector<16x128xbf16>, vector<128x128xbf16>, vector<16x128xf32> -> vector<16x128xf32>
    %c0_3 = arith.constant 0 : index
    %c0_4 = arith.constant 0 : index
    %3 = vector.load %arg3[%c0_3, %c0_4] : memref<1x128xf32, #tpu.memory_space<vmem>>, vector<1x128xf32>
    %4 = vector.broadcast %3 : vector<1x128xf32> to vector<16x128xf32>
    %5 = arith.addf %2, %4 : vector<16x128xf32>
    %cst_5 = arith.constant dense<0xFF800000> : vector<16xf32>
    %6 = vector.multi_reduction <maximumf>, %5, %cst_5 [1] : vector<16x128xf32> to vector<16xf32>
    %7 = vector.shape_cast %6 : vector<16xf32> to vector<16x1xf32>
    %8 = vector.broadcast %7 : vector<16x1xf32> to vector<16x128xf32>
    %9 = arith.subf %5, %8 : vector<16x128xf32>
    %10 = math.exp %9 : vector<16x128xf32>
    %cst_6 = arith.constant dense<0.000000e+00> : vector<16xf32>
    %11 = vector.multi_reduction <add>, %10, %cst_6 [1] : vector<16x128xf32> to vector<16xf32>
    %12 = vector.shape_cast %11 : vector<16xf32> to vector<16x1xf32>
    %13 = tpu.reciprocal %12 {approx = true} : vector<16x1xf32> -> vector<16x1xf32>
    %14 = vector.broadcast %13 : vector<16x1xf32> to vector<16x128xf32>
    %15 = arith.mulf %10, %14 : vector<16x128xf32>
    %c0_7 = arith.constant 0 : index
    %c0_8 = arith.constant 0 : index
    %16 = vector.load %arg9[%c0_7, %c0_8] : memref<16x128xf32, #tpu.memory_space<vmem>>, vector<16x128xf32>
    tpu.vector_store %arg9[%c0_7, %c0_8], %15 {strides = array<i32>} : memref<16x128xf32, #tpu.memory_space<vmem>>, vector<16x128xf32>,
    %c0_9 = arith.constant 0 : index
    %c0_10 = arith.constant 0 : index
    %17 = vector.load %arg4[%c0_9, %c0_10] : memref<128x128xbf16, #tpu.memory_space<vmem>>, vector<128x128xbf16>
    %cst_11 = arith.constant dense<0.000000e+00> : vector<16x128xf32>
    %18 = tpu.matmul %0, %17, %cst_11 {dimension_numbers = #tpu.dot_dimension_numbers<[1], [0], [0], [1], [0, 0, 1, 1], [], []>} : vector<16x128xbf16>, vector<128x128xbf16>, vector<16x128xf32> -> vector<16x128xf32>
    %c0_12 = arith.constant 0 : index
    %c0_13 = arith.constant 0 : index
    %19 = vector.load %arg5[%c0_12, %c0_13] : memref<1x128xf32, #tpu.memory_space<vmem>>, vector<1x128xf32>
    %20 = vector.broadcast %19 : vector<1x128xf32> to vector<16x128xf32>
    %21 = arith.addf %18, %20 : vector<16x128xf32>
    %cst_14 = arith.constant 0.000000e+00 : f32
    %22 = vector.broadcast %cst_14 : f32 to vector<16x128xf32>
    %23 = arith.maximumf %21, %22 : vector<16x128xf32>
    %24 = arith.truncf %15 : vector<16x128xf32> to vector<16x128xbf16>
    %c0_15 = arith.constant 0 : index
    %c0_16 = arith.constant 0 : index
    %25 = vector.load %arg6[%c0_15, %c0_16] : memref<128x128xbf16, #tpu.memory_space<vmem>>, vector<128x128xbf16>
    %cst_17 = arith.constant dense<0.000000e+00> : vector<16x128xf32>
    %26 = tpu.matmul %24, %25, %cst_17 {dimension_numbers = #tpu.dot_dimension_numbers<[1], [0], [0], [1], [0, 0, 1, 1], [], []>} : vector<16x128xbf16>, vector<128x128xbf16>, vector<16x128xf32> -> vector<16x128xf32>
    %27 = arith.mulf %23, %26 : vector<16x128xf32>
    %28 = arith.truncf %27 : vector<16x128xf32> to vector<16x128xbf16>
    %29 = tpu.concatenate %28, %24 in 1 : vector<16x128xbf16>, vector<16x128xbf16> -> vector<16x256xbf16>
    %c0_18 = arith.constant 0 : index
    %c0_19 = arith.constant 0 : index
    %30 = vector.load %arg7[%c0_18, %c0_19] : memref<256x128xbf16, #tpu.memory_space<vmem>>, vector<256x128xbf16>
    %cst_20 = arith.constant dense<0.000000e+00> : vector<16x128xf32>
    %31 = tpu.matmul %29, %30, %cst_20 {dimension_numbers = #tpu.dot_dimension_numbers<[1], [0], [0], [1], [0, 0, 1, 1], [], []>} : vector<16x256xbf16>, vector<256x128xbf16>, vector<16x128xf32> -> vector<16x128xf32>
    %c0_21 = arith.constant 0 : index
    %c0_22 = arith.constant 0 : index
    %32 = vector.load %arg8[%c0_21, %c0_22] : memref<16x128xf32, #tpu.memory_space<vmem>>, vector<16x128xf32>
    tpu.vector_store %arg8[%c0_21, %c0_22], %31 {strides = array<i32>} : memref<16x128xf32, #tpu.memory_space<vmem>>, vector<16x128xf32>,
    return
  }
  func.func @transform_0(%arg0: i32) -> (i32, i32) {
    %c0_i32 = arith.constant 0 : i32
    %c0_i32_0 = arith.constant 0 : i32
    return %arg0, %c0_i32 : i32, i32
  }
  func.func @transform_1(%arg0: i32) -> (i32, i32) {
    %c0_i32 = arith.constant 0 : i32
    %c0_i32_0 = arith.constant 0 : i32
    %c0_i32_1 = arith.constant 0 : i32
    return %c0_i32, %c0_i32_0 : i32, i32
  }
  func.func @transform_2(%arg0: i32) -> (i32, i32) {
    %c0_i32 = arith.constant 0 : i32
    %c0_i32_0 = arith.constant 0 : i32
    %c0_i32_1 = arith.constant 0 : i32
    return %c0_i32, %c0_i32_0 : i32, i32
  }
  func.func @transform_3(%arg0: i32) -> (i32, i32) {
    %c0_i32 = arith.constant 0 : i32
    %c0_i32_0 = arith.constant 0 : i32
    %c0_i32_1 = arith.constant 0 : i32
    return %c0_i32, %c0_i32_0 : i32, i32
  }
  func.func @transform_4(%arg0: i32) -> (i32, i32) {
    %c0_i32 = arith.constant 0 : i32
    %c0_i32_0 = arith.constant 0 : i32
    %c0_i32_1 = arith.constant 0 : i32
    return %c0_i32, %c0_i32_0 : i32, i32
  }
  func.func @transform_5(%arg0: i32) -> (i32, i32) {
    %c0_i32 = arith.constant 0 : i32
    %c0_i32_0 = arith.constant 0 : i32
    %c0_i32_1 = arith.constant 0 : i32
    return %c0_i32, %c0_i32_0 : i32, i32
  }
  func.func @transform_6(%arg0: i32) -> (i32, i32) {
    %c0_i32 = arith.constant 0 : i32
    %c0_i32_0 = arith.constant 0 : i32
    %c0_i32_1 = arith.constant 0 : i32
    return %c0_i32, %c0_i32_0 : i32, i32
  }
  func.func @transform_7(%arg0: i32) -> (i32, i32) {
    %c0_i32 = arith.constant 0 : i32
    %c0_i32_0 = arith.constant 0 : i32
    return %arg0, %c0_i32 : i32, i32
  }
  func.func @transform_8(%arg0: i32) -> (i32, i32) {
    %c0_i32 = arith.constant 0 : i32
    %c0_i32_0 = arith.constant 0 : i32
    return %arg0, %c0_i32 : i32, i32
  }
}

</mosaic_0001>

<bundles_post_ra>
// kernel: tpu_custom_call.1
= control target key start
LH: loop header
LB: loop body
LE: loop exit
PB: predicated region body
PF: predicated region fallthrough
CT: control target
= control target key end

     0   :  { %14 = vsyncpa [#allocation3], 0  ;;  %s1086_s0 = inlined_call_operand.hbm [shape: bf16[16,128], index: 0, kind: input, shape index: {}]   ;;  %s1087_s1 = inlined_call_operand.hbm [shape: bf16[128,128], index: 1, kind: input, shape index: {}]   ;;  %s1088_s2 = inlined_call_operand.vmem [shape: f32[1,128], index: 2, kind: input, shape index: {}]   ;;  %s1089_s3 = inlined_call_operand.hbm [shape: bf16[128,128], index: 3, kind: input, shape index: {}]   ;;  %s1090_s4 = inlined_call_operand.vmem [shape: f32[1,128], index: 4, kind: input, shape index: {}]   ;;  %s1091_s5 = inlined_call_operand.hbm [shape: bf16[128,128], index: 5, kind: input, shape index: {}]   ;;  %s1092_s6 = inlined_call_operand.hbm [shape: bf16[256,128], index: 6, kind: input, shape index: {}]   ;;  %s1093_s7 = inlined_call_operand.hbm [shape: f32[16,128], index: 7, kind: output, shape index: {0}]   ;;  %s1094_s8 = inlined_call_operand.hbm [shape: f32[16,128], index: 8, kind: output, shape index: {1}]  }
   0x1   :  { %15 = vsyncpa [#allocation6], 0 }
   0x2   :  { %16 = vsyncpa [#allocation9], 0 }
   0x3   :  { %17 = vsyncpa [#allocation4], 0 }
   0x4   :  { %18 = vsyncpa [#allocation13], 0  ;;  %s36_s29 = sshll.u32 %s1087_s1, 4  ;;  %s999_s30 = smov [#allocation5]   ;;  %s37_s29 = int_to_ptr.hbm [resolvable:$true] %s36_s29 }
   0x5   :  { %s38_s9 = sshll.u32 %s999_s30, 4  ;;  %s66_s12 = sshll.u32 %s1091_s5, 4  ;;  %s39_s9 = int_to_ptr.vmem [resolvable:$true] %s38_s9  ;;  %s67_s12 = int_to_ptr.hbm [resolvable:$true] %s66_s12 }
   0x6   :  { %s1000_s13 = smov 64   ;;  %s1001_s14 = smov 4  }
   0x7   :  { %44 = dma.hbm_to_vmem [thread:$0]  %s37_s29, 1024, %s39_s9, [#allocation6], %s1000_s13, %s1000_s13, %s1001_s14  }
   0x8   :  { %s1002_s15 = smov [#allocation8]   ;;  %s23_s19 = sshll.u32 %s1086_s0, 4  ;;  %s24_s19 = int_to_ptr.hbm [resolvable:$true] %s23_s19 }
   0x9   :  { %s68_s16 = sshll.u32 %s1002_s15, 4  ;;  %s51_s21 = sshll.u32 %s1089_s3, 4  ;;  %s69_s16 = int_to_ptr.vmem [resolvable:$true] %s68_s16  ;;  %s52_s21 = int_to_ptr.hbm [resolvable:$true] %s51_s21 }
   0xa   :  { %74 = dma.hbm_to_vmem [thread:$0]  %s67_s12, 1024, %s69_s16, [#allocation9], %s1000_s13, %s1000_s13, %s1001_s14  }
   0xb   :  { %s1003_s22 = smov [#allocation2]   ;;  %s1004_s5 = smov [#allocation7]  }
   0xc   :  { %s25_s23 = sshll.u32 %s1003_s22, 4  ;;  %s53_s24 = sshll.u32 %s1004_s5, 4  ;;  %s26_s23 = int_to_ptr.vmem [resolvable:$true] %s25_s23  ;;  %s54_s24 = int_to_ptr.vmem [resolvable:$true] %s53_s24 }
   0xd   :  { %31 = dma.hbm_to_vmem [thread:$0]  %s24_s19, 128, %s26_s23, [#allocation3], %s1000_s13, %s1000_s13, %s1001_s14  }
   0xe   :  { %s79_s27 = sshll.u32 %s1092_s6, 4  ;;  %s1005_s0 = smov [#allocation10]   ;;  %s80_s27 = int_to_ptr.hbm [resolvable:$true] %s79_s27 }
   0xf   :  { %59 = dma.hbm_to_vmem [thread:$0]  %s52_s21, 1024, %s54_s24, [#allocation6], %s1000_s13, %s1000_s13, %s1001_s14  }
  0x10   :  { %s81_s28 = sshll.u32 %s1005_s0, 4  ;;  %s82_s28 = int_to_ptr.vmem [resolvable:$true] %s81_s28 }
  0x11   :  { %87 = dma.hbm_to_vmem [thread:$0]  %s80_s27, 2048, %s82_s28, [#allocation9], %s1000_s13, %s1000_s13, %s1001_s14  }
  0x12   :  { %989 = dma.done.wait [#allocation3], 128  }
  0x13   :  { %990 = vsyncadd [#allocation3], 4294967168 }
  0x14   :  { %991 = dma.done.wait [#allocation6], 2048  }
  0x15   :  { %992 = vsyncadd [#allocation6], 4294965248 }
  0x16   :  { %993 = dma.done.wait [#allocation9], 3072  }
  0x17   :  { %994 = vsyncadd [#allocation9], 4294964224  ;;  %v767_v0 = vld [vmem:[#allocation5 + $0x38] sm:$0xff]  ;;  %v766_v1 = vld [vmem:[#allocation5 + $0x30] sm:$0xff]  ;;  %s1006_s30 = smov [#allocation12]   ;;  %s1007_s12 = smov 128  }
  0x18   :  { %184 = vmatpush.bf16.msra.mxu0 %v767_v0  ;;  %v765_v2 = vld [vmem:[#allocation5 + $0x28] sm:$0xff]  ;;  %v764_v3 = vld [vmem:[#allocation5 + $0x20] sm:$0xff]  ;;  %v763_v4 = vld [vmem:[#allocation5 + $0x18] sm:$0xff]  ;;  %s573_s9 = sshll.u32 %s1006_s30, 4  ;;  %s1008_s13 = smov 8   ;;  %s574_s9 = int_to_ptr.vmem [resolvable:$true] %s573_s9 }
  0x19   :  { %v762_v5 = vld [vmem:[#allocation5 + $0x10] sm:$0xff]  ;;  %v761_v6 = vld [vmem:[#allocation5 + $0x8] sm:$0xff]  ;;  %v760_v7 = vld [vmem:[#allocation5] sm:$0xff]  ;;  %s1009_s14 = smov [#allocation11]   ;;  %s562_s18 = sshll.u32 %s1093_s7, 4  ;;  %s563_s18 = int_to_ptr.hbm [resolvable:$true] %s562_s18 }
  0x1a   :  { %v1070_v8 = vld [vmem:[#allocation2] sm:$0xff]  ;;  %v774_v17 = vld [vmem:[#allocation7 + $0x30] sm:$0xff]  ;;  %v773_v20 = vld [vmem:[#allocation7 + $0x28] sm:$0xff]  ;;  %s560_s15 = sshll.u32 %s1009_s14, 4  ;;  %s561_s15 = int_to_ptr.vmem [resolvable:$true] %s560_s15 }
  0x1b   :  { %v811_v9 = vld [vmem:[%s1088_s2] ss:$0 sm:$0xff]  ;;  %v782_v18 = vld [vmem:[#allocation8 + $0x30] sm:$0xff]  ;;  %v772_v21 = vld [vmem:[#allocation7 + $0x20] sm:$0xff] }
  0x1c   :  { %185 = vmatpush.bf16.msra.mxu0 %v766_v1  ;;  %v775_v14 = vld [vmem:[#allocation7 + $0x38] sm:$0xff]  ;;  %v798_v19 = vld [vmem:[#allocation10 + $0x70] sm:$0xff]  ;;  %v781_v30 = vld [vmem:[#allocation8 + $0x28] sm:$0xff] }
  0x1d   :  { %v783_v15 = vld [vmem:[#allocation8 + $0x38] sm:$0xff]  ;;  %286 = vmatpush.bf16.msra.mxu1 %v775_v14  ;;  %v797_v31 = vld [vmem:[#allocation10 + $0x68] sm:$0xff]  ;;  %v780_v33 = vld [vmem:[#allocation8 + $0x20] sm:$0xff] }
  0x1e   :  { %v799_v16 = vld [vmem:[#allocation10 + $0x78] sm:$0xff]  ;;  %374 = vmatpush.bf16.msra.mxu2 %v783_v15  ;;  %v796_v34 = vld [vmem:[#allocation10 + $0x60] sm:$0xff]  ;;  %v770_v35 = vld [vmem:[#allocation7 + $0x10] sm:$0xff] }
  0x1f   :  { %v771_v32 = vld [vmem:[#allocation7 + $0x18] sm:$0xff]  ;;  %v769_v38 = vld [vmem:[#allocation7 + $0x8] sm:$0xff]  ;;  %v778_v39 = vld [vmem:[#allocation8 + $0x10] sm:$0xff] }
  0x20   :  { %186 = vmatpush.bf16.msra.mxu0 %v765_v2  ;;  %v779_v36 = vld [vmem:[#allocation8 + $0x18] sm:$0xff]  ;;  %v794_v40 = vld [vmem:[#allocation10 + $0x50] sm:$0xff]  ;;  %v768_v41 = vld [vmem:[#allocation7] sm:$0xff] }
  0x21   :  { %287 = vmatpush.bf16.msra.mxu1 %v774_v17  ;;  %v795_v37 = vld [vmem:[#allocation10 + $0x58] sm:$0xff]  ;;  %v777_v42 = vld [vmem:[#allocation8 + $0x8] sm:$0xff]  ;;  %v776_v44 = vld [vmem:[#allocation8] sm:$0xff] }
  0x22   :  { %375 = vmatpush.bf16.msra.mxu2 %v782_v18  ;;  %v793_v43 = vld [vmem:[#allocation10 + $0x48] sm:$0xff]  ;;  %v792_v45 = vld [vmem:[#allocation10 + $0x40] sm:$0xff]  ;;  %v791_v46 = vld [vmem:[#allocation10 + $0x38] sm:$0xff] }
  0x23   :  { %526 = vmatpush.bf16.msra.mxu3 %v791_v46  ;;  %v790_v58 = vld [vmem:[#allocation10 + $0x30] sm:$0xff]  ;;  %v789_v59 = vld [vmem:[#allocation10 + $0x28] sm:$0xff]  ;;  %v788_v60 = vld [vmem:[#allocation10 + $0x20] sm:$0xff] }
  0x24   :  { %187 = vmatpush.bf16.msra.mxu0 %v764_v3  ;;  %v787_v61 = vld [vmem:[#allocation10 + $0x18] sm:$0xff]  ;;  %v786_v62 = vld [vmem:[#allocation10 + $0x10] sm:$0xff]  ;;  %v785_v63 = vld [vmem:[#allocation10 + $0x8] sm:$0xff] }
  0x25   :  { %288 = vmatpush.bf16.msra.mxu1 %v773_v20  ;;  %v784_v0 = vld [vmem:[#allocation10] sm:$0xff]  ;;  %v812_v2 = vld [vmem:[%s1090_s4] ss:$0 sm:$0xff]  ;;  %s575_s4 = sshll.u32 %s1094_s8, 4  ;;  %s576_s4 = int_to_ptr.hbm [resolvable:$true] %s575_s4 }
  0x26   :  { %376 = vmatpush.bf16.msra.mxu2 %v781_v30 }
  0x27   :  { %527 = vmatpush.bf16.msra.mxu3 %v790_v58 }
  0x28   :  { %188 = vmatpush.bf16.msra.mxu0 %v763_v4 }
  0x29   :  { %289 = vmatpush.bf16.msra.mxu1 %v772_v21 }
  0x2a   :  { %377 = vmatpush.bf16.msra.mxu2 %v780_v33 }
  0x2b   :  { %528 = vmatpush.bf16.msra.mxu3 %v789_v59 }
  0x2c   :  { %189 = vmatpush.bf16.msra.mxu0 %v762_v5 }
  0x2d   :  { %290 = vmatpush.bf16.msra.mxu1 %v771_v32 }
  0x2e   :  { %378 = vmatpush.bf16.msra.mxu2 %v779_v36 }
  0x2f   :  { %529 = vmatpush.bf16.msra.mxu3 %v788_v60 }
  0x30   :  { %190 = vmatpush.bf16.msra.mxu0 %v761_v6 }
  0x31   :  { %291 = vmatpush.bf16.msra.mxu1 %v770_v35 }
  0x32   :  { %379 = vmatpush.bf16.msra.mxu2 %v778_v39 }
  0x33   :  { %530 = vmatpush.bf16.msra.mxu3 %v787_v61 }
  0x34   :  { %191 = vmatpush.bf16.msra.mxu0 %v760_v7 }
  0x35   :  { %292 = vmatpush.bf16.msra.mxu1 %v769_v38 }
  0x36   :  { %380 = vmatpush.bf16.msra.mxu2 %v777_v42 }
  0x37   :  { %192 = vmatmul.bf16.vlgmr.msra.gmra.mxu0 %v1070_v8  ;;  %531 = vmatpush.bf16.msra.mxu3 %v786_v62 }
  0x38   :  { %540 = vmatpush.bf16.msrb.mxu0 %v799_v16 }
  0x39   :  { %293 = vmatpush.bf16.msra.mxu1 %v768_v41 }
  0x3a   :  { %381 = vmatpush.bf16.msra.mxu2 %v776_v44 }
  0x3b   :  { %532 = vmatpush.bf16.msra.mxu3 %v785_v63 }
  0x3c   :  { %541 = vmatpush.bf16.msrb.mxu0 %v798_v19  ;;  %294 = vmatmul.bf16.vlgmr.msra.gmra.mxu1 %v1070_v8 }
  0x3f   :  { %533 = vmatpush.bf16.msra.mxu3 %v784_v0 }
  0x40   :  { %542 = vmatpush.bf16.msrb.mxu0 %v797_v31 }
  0x44   :  { %543 = vmatpush.bf16.msrb.mxu0 %v796_v34 }
  0x48   :  { %544 = vmatpush.bf16.msrb.mxu0 %v795_v37 }
  0x4c   :  { %545 = vmatpush.bf16.msrb.mxu0 %v794_v40 }
  0x50   :  { %546 = vmatpush.bf16.msrb.mxu0 %v793_v43 }
  0x54   :  { %547 = vmatpush.bf16.msrb.mxu0 %v792_v45 }
  0xb4   :  { %v193_v10 = vpop.f32.mrf.mxu0 }
  0xb5   :  { %v194_v11 = vadd.f32 %v811_v9, %v193_v10 }
  0xb7   :  { %198 = vmax.xlane.f32.xlu0 %v194_v11 }
  0xb9   :  { %v295_v1 = vpop.f32.mrf.mxu1 }
  0xba   :  { %v296_v3 = vadd.f32 %v812_v2, %v295_v1 }
  0xbc   :  { %v195_v12 = vpop.f32.mrf.mxu0  ;;  %v300_v6 = vmax.f32 %v296_v3, 0.0 }
  0xbd   :  { %v196_v13 = vadd.f32 %v811_v9, %v195_v12 }
  0xbf   :  { %200 = vmax.xlane.f32.xlu0 %v196_v13 }
  0xc1   :  { %v297_v4 = vpop.f32.mrf.mxu1 }
  0xc2   :  { %v298_v7 = vadd.f32 %v812_v2, %v297_v4 }
  0xc4   :  { %v301_v9 = vmax.f32 %v298_v7, 0.0 }
 0x12a   :  { %v199_v22 = vpop.xlane.xlu0 %198 }
 0x12b   :  { %v202_v23 = vsub.f32 %v194_v11, %v199_v22 }
 0x12d   :  { %v204_v24 = vmul.f32 1.442695, %v202_v23 }
 0x12f   :  { %813 = vpow2.f32 %v204_v24 }
 0x132   :  { %v201_v25 = vpop.xlane.xlu0 %200 }
 0x133   :  { %v203_v26 = vsub.f32 %v196_v13, %v201_v25 }
 0x135   :  { %v814_v27 = vpop.eup %813  ;;  %v206_v28 = vmul.f32 1.442695, %v203_v26 }
 0x136   :  { %208 = vadd.xlane.f32.xlu1 %v814_v27 }
 0x137   :  { %815 = vpow2.f32 %v206_v28 }
 0x13d   :  { %v816_v29 = vpop.eup %815 }
 0x13e   :  { %210 = vadd.xlane.f32.xlu1 %v816_v29 }
 0x1a9   :  { %v209_v47 = vpop.xlane.xlu1 %208 }
 0x1aa   :  { %817 = vrcp.f32 %v209_v47 }
 0x1b0   :  { %v818_v48 = vpop.eup %817 }
 0x1b1   :  { %v211_v49 = vpop.xlane.xlu1 %210  ;;  %v214_v50 = vmul.f32 %v818_v48, %v814_v27 }
 0x1b2   :  { %819 = vrcp.f32 %v211_v49 }
 0x1b3   :  { %216 = vst [vmem:[#allocation12] sm:$0xff] %v214_v50  ;;  %v302_v53 = vpack.c.bf16 %v214_v50, %v214_v50 }
 0x1b5   :  { %v322_v55 = vunpack.c.l.b16 %v302_v53 }
 0x1b8   :  { %v820_v51 = vpop.eup %819 }
 0x1b9   :  { %v215_v52 = vmul.f32 %v820_v51, %v816_v29 }
 0x1bb   :  { %217 = vst [vmem:[#allocation12 + $0x8] sm:$0xff] %v215_v52  ;;  %v303_v54 = vpack.c.bf16 %v215_v52, %v215_v52 }
 0x1bc   :  { %581 = dma.vmem_to_hbm [thread:$0]  %s574_s9, 256, %s576_s4, [#allocation13], %s1007_s12, %s1007_s12, %s1008_s13  }
 0x1bd   :  { %v323_v56 = vunpack.c.l.b16 %v303_v54 }
 0x1bf   :  { %v324_v57 = vpack.c.b16 %v323_v56, %v322_v55 }
 0x1c1   :  { %382 = vmatmul.bf16.vlgmr.msra.gmra.mxu2 %v324_v57  ;;  %548 = vmatmul.bf16.vlgmr.msrb.gmra.mxu0 %v324_v57 }
 0x23e   :  { %v549_v17 = vpop.f32.mrf.mxu0 }
 0x244   :  { %v383_v5 = vpop.f32.mrf.mxu2 }
 0x245   :  { %v388_v8 = vmul.f32 %v383_v5, %v300_v6 }
 0x246   :  { %v551_v20 = vpop.f32.mrf.mxu0 }
 0x247   :  { %v390_v11 = vpack.c.bf16 %v388_v8, %v388_v8 }
 0x249   :  { %v394_v14 = vunpack.c.l.b16 %v390_v11 }
 0x24c   :  { %v385_v10 = vpop.f32.mrf.mxu2 }
 0x24d   :  { %v389_v12 = vmul.f32 %v385_v10, %v301_v9 }
 0x24f   :  { %v391_v13 = vpack.c.bf16 %v389_v12, %v389_v12 }
 0x251   :  { %v395_v15 = vunpack.c.l.b16 %v391_v13 }
 0x253   :  { %v396_v16 = vpack.c.b16 %v395_v15, %v394_v14 }
 0x255   :  { %534 = vmatmul.bf16.vlgmr.msra.gmra.mxu3 %v396_v16 }
 0x2d8   :  { %v535_v18 = vpop.f32.mrf.mxu3 }
 0x2d9   :  { %v550_v19 = vadd.f32 %v549_v17, %v535_v18 }
 0x2db   :  { %554 = vst [vmem:[#allocation11] sm:$0xff] %v550_v19 }
 0x2e0   :  { %v537_v21 = vpop.f32.mrf.mxu3 }
 0x2e1   :  { %v552_v22 = vadd.f32 %v551_v20, %v537_v21 }
 0x2e3   :  { %555 = vst [vmem:[#allocation11 + $0x8] sm:$0xff] %v552_v22 }
 0x2e4   :  { %568 = dma.vmem_to_hbm [thread:$0]  %s561_s15, 256, %s563_s18, [#allocation4], %s1007_s12, %s1007_s12, %s1008_s13  }
 0x2e5   :  { %995 = dma.done.wait [#allocation4], 256  }
 0x2e6   :  { %996 = vsyncadd [#allocation4], 4294967040 }
 0x2e7   :  { %997 = dma.done.wait [#allocation13], 256  }
 0x2e8   :  { %998 = vsyncadd [#allocation13], 4294967040 }
 0x2e9   :  { %590 = vsyncpa [#allocation3], 1 }
 0x2ea   :  { %591 = vsyncpa [#allocation6], 1 }
 0x2eb   :  { %592 = vsyncpa [#allocation9], 1 }
 0x2ec   :  { %593 = vsyncpa [#allocation4], 1 }
 0x2ed   :  { %594 = vsyncpa [#allocation13], 1 }

</bundles_post_ra>
